<compile_context>
chip_gen: v6e
topology: v6e:2x2x1
jax: 0.10.0
libtpu: 0.0.40
codegen_flags: <defaults>
</compile_context>

<pallas_src>
import functools

import jax
import jax.numpy as jnp
from jax.experimental import pallas as pl
from jax.experimental.pallas import tpu as pltpu


def channel_attention_kernel(x_ref, wqk_ref, wv_ref, wp_ref, o_ref, *,
                             num_heads, head_dim, embed_dim, block_b):
    # x_ref  : (block_b, C, N) f32
    # wqk_ref: (2E, C) bf16  -- [scale*Wq ; Wk] in PyTorch Linear (out, in) layout
    # wv_ref : (E, C)  f32
    # wp_ref : (C, E)  f32   -- (1/N) already folded in
    # o_ref  : (block_b, C, N) f32
    E = embed_dim
    hd = head_dim
    nh = num_heads

    wqk = wqk_ref[...]          # loaded once, reused for every batch element
    wv = wv_ref[...]
    wp = wp_ref[...]

    def body(bb, carry):
        # ---- fused Q/K projection: one bf16 MXU matmul, f32 accumulation ------
        x_bf = x_ref[bb].astype(jnp.bfloat16)                           # (C, N)
        qk = jnp.dot(wqk, x_bf, preferred_element_type=jnp.float32)     # (2E, N)
        qt = qk[:E, :]                     # scale already folded into Wq rows
        kt_t = qk[E:, :].T                 # ONE shared transpose -> (N, E)

        # ---- V projection eliminated: per-head lane row-sums of x (f32) ------
        xsum = jnp.concatenate(
            [jnp.sum(x_ref[bb, :, h * hd:(h + 1) * hd], axis=-1, keepdims=True)
             for h in range(nh)], axis=-1)                              # (C, nh)
        v_rowsum = jnp.dot(wv, xsum,
                           preferred_element_type=jnp.float32)          # (E, nh)

        # ---- per-head scores stacked along sublanes -> ONE batched softmax ---
        scores = jnp.concatenate(
            [jnp.dot(qt[:, h * hd:(h + 1) * hd],
                     kt_t[h * hd:(h + 1) * hd, :],
                     preferred_element_type=jnp.float32)
             for h in range(nh)], axis=0)                                # (nh*E, E)
        scores = scores - jnp.max(scores, axis=-1, keepdims=True)
        p = jnp.exp(scores)
        p = p * (1.0 / jnp.sum(p, axis=-1, keepdims=True))              # exact softmax

        # ---- sum_h p_h @ rowsum_h(V): only the row-mean of attn_out is needed -
        acc = jnp.zeros((E, 1), jnp.float32)
        for h in range(nh):
            acc = acc + jnp.dot(p[h * E:(h + 1) * E, :],
                                v_rowsum[:, h:h + 1],
                                preferred_element_type=jnp.float32)     # (E, 1)

        # ---- proj (1/N folded into Wp) + sigmoid -> per-channel gate ----------
        logits = jnp.dot(wp, acc, preferred_element_type=jnp.float32)   # (C, 1)
        w_col = jax.nn.sigmoid(logits)

        # channel-wise gate; re-read the tile from VMEM so it is not kept live
        # in vregs across the attention math above.
        o_ref[bb] = (x_ref[bb] * w_col).astype(o_ref.dtype)
        return carry

    if block_b <= 4:
        for bb in range(block_b):        # short static trip count -> unrolled
            body(bb, 0)
    else:
        jax.lax.fori_loop(0, block_b, body, 0)   # compact body, bounded live ranges


def _pick_block_b(B, per_elem_bytes, fixed_bytes, budget):
    """Largest block_b (divisor of B) whose double-buffered in+out blocks fit the
    VMEM budget, preferring >=2 and even grid-step counts (v7x has 2 TCs)."""
    min_steps = 2 if B >= 2 else 1
    divisors = [d for d in range(B, 0, -1) if B % d == 0]

    def fits(d):
        return 4 * d * per_elem_bytes + fixed_bytes <= budget

    for d in divisors:                    # pass 1: even number of grid steps
        if B // d >= min_steps and (B // d) % 2 == 0 and fits(d):
            return d
    for d in divisors:                    # pass 2: any count >= min_steps
        if B // d >= min_steps and fits(d):
            return d
    return 1


def channel_attention(x, wq, wk, wv, wp, num_heads=4, block_b=None):
    """x: (B, C, H, W) f32; wq/wk/wv: (E, C); wp: (C, E) (PyTorch Linear layout)."""
    B, C, H, W = x.shape
    N = H * W
    assert N % num_heads == 0, "H*W must be divisible by num_heads"
    head_dim = N // num_heads
    scale = float(head_dim) ** -0.5
    E = wq.shape[0]
    assert E == C, "PyTorch forward only shape-checks when embed_dim == in_channels"
    assert wk.shape == (E, C) and wv.shape == (E, C) and wp.shape == (C, E)

    # Host-side folding: scale into Wq, 1/N into Wp; fuse the Q/K weights and
    # cast the big projection operand to bf16 (MXU-native on v5e/v6e/v7x).
    wqk = jnp.concatenate([wq * scale, wk], axis=0).astype(jnp.bfloat16)   # (2E, C)
    wv_f = wv.astype(jnp.float32)                                          # (E, C)
    wp_f = (wp * (1.0 / N)).astype(jnp.float32)                            # (C, E)

    # Generation-aware VMEM budget (~75% of physical capacity).
    try:
        info = pltpu.get_tpu_info()
        vmem_cap = int(getattr(info, "vmem_capacity_bytes", 64 << 20))
    except Exception:
        vmem_cap = 64 << 20          # conservative fallback (v7x-sized)
    budget = (vmem_cap * 3) // 4

    itemsize = x.dtype.itemsize
    per_elem_bytes = C * N * itemsize
    weight_bytes = (wqk.size * wqk.dtype.itemsize
                    + (wv_f.size + wp_f.size) * 4)
    fixed_bytes = 2 * weight_bytes + (2 << 20)   # weights (possibly 2-buffered) + scratch

    # Capacity-aware batch packing; amortizes the ~0.35us/step pipeline overhead.
    # NOTE: when B == 1 one v7x TensorCore idles; a second parallel grid axis over
    # N-tiles of the gating pass could recover it, but is not worth it here.
    if block_b is None:
        block_b = _pick_block_b(B, per_elem_bytes, fixed_bytes, budget)
    assert B % block_b == 0
    num_steps = B // block_b

    block_bytes = block_b * per_elem_bytes
    need = 4 * block_bytes + fixed_bytes + (4 << 20)
    vmem_limit = int(min(max(need, 32 << 20), budget))

    x_flat = x.reshape(B, C, N)

    kern = functools.partial(
        channel_attention_kernel,
        num_heads=num_heads, head_dim=head_dim, embed_dim=E, block_b=block_b)

    out = pl.pallas_call(
        kern,
        out_shape=jax.ShapeDtypeStruct((B, C, N), x.dtype),
        grid_spec=pltpu.PrefetchScalarGridSpec(
            num_scalar_prefetch=0,
            grid=(num_steps,),
            in_specs=[
                pl.BlockSpec((block_b, C, N), lambda b: (b, 0, 0)),
                pl.BlockSpec((2 * E, C), lambda b: (0, 0)),   # constant index -> fetched once
                pl.BlockSpec((E, C), lambda b: (0, 0)),
                pl.BlockSpec((C, E), lambda b: (0, 0)),
            ],
            out_specs=pl.BlockSpec((block_b, C, N), lambda b: (b, 0, 0)),
        ),
        compiler_params=pltpu.CompilerParams(
            dimension_semantics=("parallel",),
            vmem_limit_bytes=vmem_limit,
        ),
    )(x_flat, wqk, wv_f, wp_f)

    return out.reshape(B, C, H, W)


def channel_attention_ref(x, wq, wk, wv, wp, num_heads=4):
    """Pure-JAX reference mirroring the PyTorch forward exactly."""
    B, C, H, W = x.shape
    N = H * W
    head_dim = N // num_heads
    scale = float(head_dim) ** -0.5
    desc = x.reshape(B, C, N).transpose(0, 2, 1)             # (B, N, C)
    Q = (desc @ wq.T).transpose(0, 2, 1)                     # (B, E, N)
    K = (desc @ wk.T).transpose(0, 2, 1)
    V = (desc @ wv.T).transpose(0, 2, 1)
    E = Q.shape[1]
    Q = Q.reshape(B, E, num_heads, head_dim).transpose(0, 2, 1, 3)   # (B, nh, E, hd)
    K = K.reshape(B, E, num_heads, head_dim).transpose(0, 2, 1, 3)
    V = V.reshape(B, E, num_heads, head_dim).transpose(0, 2, 1, 3)
    scores = jnp.einsum('bhed,bhfd->bhef', Q, K) * scale
    probs = jax.nn.softmax(scores, axis=-1)
    attn = jnp.einsum('bhef,bhfd->bhed', probs, V)            # (B, nh, E, hd)
    attn = attn.transpose(0, 2, 1, 3).reshape(B, C, -1).mean(axis=-1)  # (B, C)
    out = attn @ wp.T                                         # (B, C)
    w = jax.nn.sigmoid(out).reshape(B, C, 1, 1)
    return x * w


if __name__ == "__main__":
    # Small shapes consistent with the module: N = H*W = 1024 (lane-dense, 128|N),
    # head_dim = 256 (128-aligned head slices), embed_dim == in_channels as the
    # PyTorch forward implicitly requires.
    B, C, H, W = 2, 8, 32, 32
    E = C
    num_heads = 4

    key = jax.random.PRNGKey(0)
    kx, kq, kk, kv, kp = jax.random.split(key, 5)

    x = jax.random.normal(kx, (B, C, H, W), dtype=jnp.float32)
    # deterministic synthetic weights, PyTorch Linear layout (out, in)
    wq = jax.random.normal(kq, (E, C), dtype=jnp.float32) * 0.2
    wk = jax.random.normal(kk, (E, C), dtype=jnp.float32) * 0.2
    wv = jax.random.normal(kv, (E, C), dtype=jnp.float32) * 0.2
    wp = jax.random.normal(kp, (C, E), dtype=jnp.float32) * 0.2

    out = channel_attention(x, wq, wk, wv, wp, num_heads=num_heads)
    out = jax.block_until_ready(out)

    ref = channel_attention_ref(x, wq, wk, wv, wp, num_heads=num_heads)
    # bf16 MXU operands for the Q/K projection -> slightly relaxed tolerance
    if not jnp.allclose(out, ref, atol=5e-3, rtol=5e-3):
        err = float(jnp.max(jnp.abs(out - ref)))
        raise AssertionError(f"Pallas kernel mismatch vs JAX reference (max abs err={err})")

    print("KERNEL_OK")
</pallas_src>

<mosaic_0001>
module attributes {stable_mosaic.version = 11 : i64} {
  func.func @channel_attention_kernel(%arg0: i32, %arg1: memref<1x8x1024xf32, #tpu.memory_space<vmem>>, %arg2: memref<16x8xbf16, #tpu.memory_space<vmem>>, %arg3: memref<8x8xf32, #tpu.memory_space<vmem>>, %arg4: memref<8x8xf32, #tpu.memory_space<vmem>>, %arg5: memref<1x8x1024xf32, #tpu.memory_space<vmem>>) attributes {dimension_semantics = [#tpu.dimension_semantics<parallel>], iteration_bounds = array<i64: 2>, scalar_prefetch = 0 : i64, scratch_operands = 0 : i64, tpu.core_type = #tpu.core_type<tc>, window_params = [{transform_indices = @transform_0, window_bounds = array<i64: 1, 8, 1024>}, {pipeline_mode = #tpu.pipeline_mode<synchronous>, transform_indices = @transform_1, window_bounds = array<i64: 16, 8>}, {pipeline_mode = #tpu.pipeline_mode<synchronous>, transform_indices = @transform_2, window_bounds = array<i64: 8, 8>}, {pipeline_mode = #tpu.pipeline_mode<synchronous>, transform_indices = @transform_3, window_bounds = array<i64: 8, 8>}, {transform_indices = @transform_4, window_bounds = array<i64: 1, 8, 1024>}]} {
    %c0 = arith.constant 0 : index
    %c0_0 = arith.constant 0 : index
    %0 = vector.load %arg2[%c0, %c0_0] : memref<16x8xbf16, #tpu.memory_space<vmem>>, vector<16x8xbf16>
    %c0_1 = arith.constant 0 : index
    %c0_2 = arith.constant 0 : index
    %1 = vector.load %arg3[%c0_1, %c0_2] : memref<8x8xf32, #tpu.memory_space<vmem>>, vector<8x8xf32>
    %c0_3 = arith.constant 0 : index
    %c0_4 = arith.constant 0 : index
    %2 = vector.load %arg4[%c0_3, %c0_4] : memref<8x8xf32, #tpu.memory_space<vmem>>, vector<8x8xf32>
    %c0_5 = arith.constant 0 : index
    %c0_6 = arith.constant 0 : index
    %c0_7 = arith.constant 0 : index
    %3 = vector.load %arg1[%c0_5, %c0_6, %c0_7] : memref<1x8x1024xf32, #tpu.memory_space<vmem>>, vector<1x8x1024xf32>
    %4 = vector.shape_cast %3 : vector<1x8x1024xf32> to vector<8x1024xf32>
    %5 = arith.truncf %4 : vector<8x1024xf32> to vector<8x1024xbf16>
    %cst = arith.constant dense<0.000000e+00> : vector<16x1024xf32>
    %6 = tpu.matmul %0, %5, %cst {dimension_numbers = #tpu.dot_dimension_numbers<[1], [0], [0], [1], [0, 0, 1, 1], [], []>} : vector<16x8xbf16>, vector<8x1024xbf16>, vector<16x1024xf32> -> vector<16x1024xf32>
    %7 = vector.extract_strided_slice %6 {offsets = [0, 0], sizes = [8, 1024], strides = [1, 1]} : vector<16x1024xf32> to vector<8x1024xf32>
    %8 = vector.extract_strided_slice %6 {offsets = [8, 0], sizes = [8, 1024], strides = [1, 1]} : vector<16x1024xf32> to vector<8x1024xf32>
    %9 = tpu.transpose %8, [1, 0] : vector<8x1024xf32> -> vector<1024x8xf32>
    %c0_8 = arith.constant 0 : index
    %c0_9 = arith.constant 0 : index
    %c0_10 = arith.constant 0 : index
    %10 = vector.load %arg1[%c0_8, %c0_9, %c0_10] : memref<1x8x1024xf32, #tpu.memory_space<vmem>>, vector<1x8x256xf32>
    %11 = vector.shape_cast %10 : vector<1x8x256xf32> to vector<8x256xf32>
    %cst_11 = arith.constant dense<0.000000e+00> : vector<8xf32>
    %12 = vector.multi_reduction <add>, %11, %cst_11 [1] : vector<8x256xf32> to vector<8xf32>
    %13 = vector.shape_cast %12 : vector<8xf32> to vector<8x1xf32>
    %c0_12 = arith.constant 0 : index
    %c0_13 = arith.constant 0 : index
    %c256 = arith.constant 256 : index
    %14 = vector.load %arg1[%c0_12, %c0_13, %c256] : memref<1x8x1024xf32, #tpu.memory_space<vmem>>, vector<1x8x256xf32>
    %15 = vector.shape_cast %14 : vector<1x8x256xf32> to vector<8x256xf32>
    %cst_14 = arith.constant dense<0.000000e+00> : vector<8xf32>
    %16 = vector.multi_reduction <add>, %15, %cst_14 [1] : vector<8x256xf32> to vector<8xf32>
    %17 = vector.shape_cast %16 : vector<8xf32> to vector<8x1xf32>
    %c0_15 = arith.constant 0 : index
    %c0_16 = arith.constant 0 : index
    %c512 = arith.constant 512 : index
    %18 = vector.load %arg1[%c0_15, %c0_16, %c512] : memref<1x8x1024xf32, #tpu.memory_space<vmem>>, vector<1x8x256xf32>
    %19 = vector.shape_cast %18 : vector<1x8x256xf32> to vector<8x256xf32>
    %cst_17 = arith.constant dense<0.000000e+00> : vector<8xf32>
    %20 = vector.multi_reduction <add>, %19, %cst_17 [1] : vector<8x256xf32> to vector<8xf32>
    %21 = vector.shape_cast %20 : vector<8xf32> to vector<8x1xf32>
    %c0_18 = arith.constant 0 : index
    %c0_19 = arith.constant 0 : index
    %c768 = arith.constant 768 : index
    %22 = vector.load %arg1[%c0_18, %c0_19, %c768] : memref<1x8x1024xf32, #tpu.memory_space<vmem>>, vector<1x8x256xf32>
    %23 = vector.shape_cast %22 : vector<1x8x256xf32> to vector<8x256xf32>
    %cst_20 = arith.constant dense<0.000000e+00> : vector<8xf32>
    %24 = vector.multi_reduction <add>, %23, %cst_20 [1] : vector<8x256xf32> to vector<8xf32>
    %25 = vector.shape_cast %24 : vector<8xf32> to vector<8x1xf32>
    %26 = tpu.concatenate %13, %17, %21, %25 in 1 : vector<8x1xf32>, vector<8x1xf32>, vector<8x1xf32>, vector<8x1xf32> -> vector<8x4xf32>
    %cst_21 = arith.constant dense<0.000000e+00> : vector<8x4xf32>
    %27 = tpu.matmul %1, %26, %cst_21 {dimension_numbers = #tpu.dot_dimension_numbers<[1], [0], [0], [1], [0, 0, 1, 1], [], []>} : vector<8x8xf32>, vector<8x4xf32>, vector<8x4xf32> -> vector<8x4xf32>
    %28 = vector.extract_strided_slice %7 {offsets = [0, 0], sizes = [8, 256], strides = [1, 1]} : vector<8x1024xf32> to vector<8x256xf32>
    %29 = vector.extract_strided_slice %9 {offsets = [0, 0], sizes = [256, 8], strides = [1, 1]} : vector<1024x8xf32> to vector<256x8xf32>
    %cst_22 = arith.constant dense<0.000000e+00> : vector<8x8xf32>
    %30 = tpu.matmul %28, %29, %cst_22 {dimension_numbers = #tpu.dot_dimension_numbers<[1], [0], [0], [1], [0, 0, 1, 1], [], []>} : vector<8x256xf32>, vector<256x8xf32>, vector<8x8xf32> -> vector<8x8xf32>
    %31 = vector.extract_strided_slice %7 {offsets = [0, 256], sizes = [8, 256], strides = [1, 1]} : vector<8x1024xf32> to vector<8x256xf32>
    %32 = vector.extract_strided_slice %9 {offsets = [256, 0], sizes = [256, 8], strides = [1, 1]} : vector<1024x8xf32> to vector<256x8xf32>
    %cst_23 = arith.constant dense<0.000000e+00> : vector<8x8xf32>
    %33 = tpu.matmul %31, %32, %cst_23 {dimension_numbers = #tpu.dot_dimension_numbers<[1], [0], [0], [1], [0, 0, 1, 1], [], []>} : vector<8x256xf32>, vector<256x8xf32>, vector<8x8xf32> -> vector<8x8xf32>
    %34 = vector.extract_strided_slice %7 {offsets = [0, 512], sizes = [8, 256], strides = [1, 1]} : vector<8x1024xf32> to vector<8x256xf32>
    %35 = vector.extract_strided_slice %9 {offsets = [512, 0], sizes = [256, 8], strides = [1, 1]} : vector<1024x8xf32> to vector<256x8xf32>
    %cst_24 = arith.constant dense<0.000000e+00> : vector<8x8xf32>
    %36 = tpu.matmul %34, %35, %cst_24 {dimension_numbers = #tpu.dot_dimension_numbers<[1], [0], [0], [1], [0, 0, 1, 1], [], []>} : vector<8x256xf32>, vector<256x8xf32>, vector<8x8xf32> -> vector<8x8xf32>
    %37 = vector.extract_strided_slice %7 {offsets = [0, 768], sizes = [8, 256], strides = [1, 1]} : vector<8x1024xf32> to vector<8x256xf32>
    %38 = vector.extract_strided_slice %9 {offsets = [768, 0], sizes = [256, 8], strides = [1, 1]} : vector<1024x8xf32> to vector<256x8xf32>
    %cst_25 = arith.constant dense<0.000000e+00> : vector<8x8xf32>
    %39 = tpu.matmul %37, %38, %cst_25 {dimension_numbers = #tpu.dot_dimension_numbers<[1], [0], [0], [1], [0, 0, 1, 1], [], []>} : vector<8x256xf32>, vector<256x8xf32>, vector<8x8xf32> -> vector<8x8xf32>
    %40 = tpu.concatenate %30, %33, %36, %39 in 0 : vector<8x8xf32>, vector<8x8xf32>, vector<8x8xf32>, vector<8x8xf32> -> vector<32x8xf32>
    %cst_26 = arith.constant dense<0xFF800000> : vector<32xf32>
    %41 = vector.multi_reduction <maximumf>, %40, %cst_26 [1] : vector<32x8xf32> to vector<32xf32>
    %42 = vector.shape_cast %41 : vector<32xf32> to vector<32x1xf32>
    %43 = vector.broadcast %42 : vector<32x1xf32> to vector<32x8xf32>
    %44 = arith.subf %40, %43 : vector<32x8xf32>
    %45 = math.exp %44 : vector<32x8xf32>
    %cst_27 = arith.constant dense<0.000000e+00> : vector<32xf32>
    %46 = vector.multi_reduction <add>, %45, %cst_27 [1] : vector<32x8xf32> to vector<32xf32>
    %47 = vector.shape_cast %46 : vector<32xf32> to vector<32x1xf32>
    %cst_28 = arith.constant 1.000000e+00 : f32
    %48 = vector.broadcast %cst_28 : f32 to vector<32x1xf32>
    %49 = arith.divf %48, %47 : vector<32x1xf32>
    %50 = vector.broadcast %49 : vector<32x1xf32> to vector<32x8xf32>
    %51 = arith.mulf %45, %50 : vector<32x8xf32>
    %cst_29 = arith.constant 0.000000e+00 : f32
    %52 = vector.broadcast %cst_29 : f32 to vector<8x1xf32>
    %53 = vector.extract_strided_slice %51 {offsets = [0, 0], sizes = [8, 8], strides = [1, 1]} : vector<32x8xf32> to vector<8x8xf32>
    %54 = vector.extract_strided_slice %27 {offsets = [0, 0], sizes = [8, 1], strides = [1, 1]} : vector<8x4xf32> to vector<8x1xf32>
    %cst_30 = arith.constant dense<0.000000e+00> : vector<8x1xf32>
    %55 = tpu.matmul %53, %54, %cst_30 {dimension_numbers = #tpu.dot_dimension_numbers<[1], [0], [0], [1], [0, 0, 1, 1], [], []>} : vector<8x8xf32>, vector<8x1xf32>, vector<8x1xf32> -> vector<8x1xf32>
    %56 = arith.addf %52, %55 : vector<8x1xf32>
    %57 = vector.extract_strided_slice %51 {offsets = [8, 0], sizes = [8, 8], strides = [1, 1]} : vector<32x8xf32> to vector<8x8xf32>
    %58 = vector.extract_strided_slice %27 {offsets = [0, 1], sizes = [8, 1], strides = [1, 1]} : vector<8x4xf32> to vector<8x1xf32>
    %cst_31 = arith.constant dense<0.000000e+00> : vector<8x1xf32>
    %59 = tpu.matmul %57, %58, %cst_31 {dimension_numbers = #tpu.dot_dimension_numbers<[1], [0], [0], [1], [0, 0, 1, 1], [], []>} : vector<8x8xf32>, vector<8x1xf32>, vector<8x1xf32> -> vector<8x1xf32>
    %60 = arith.addf %56, %59 : vector<8x1xf32>
    %61 = vector.extract_strided_slice %51 {offsets = [16, 0], sizes = [8, 8], strides = [1, 1]} : vector<32x8xf32> to vector<8x8xf32>
    %62 = vector.extract_strided_slice %27 {offsets = [0, 2], sizes = [8, 1], strides = [1, 1]} : vector<8x4xf32> to vector<8x1xf32>
    %cst_32 = arith.constant dense<0.000000e+00> : vector<8x1xf32>
    %63 = tpu.matmul %61, %62, %cst_32 {dimension_numbers = #tpu.dot_dimension_numbers<[1], [0], [0], [1], [0, 0, 1, 1], [], []>} : vector<8x8xf32>, vector<8x1xf32>, vector<8x1xf32> -> vector<8x1xf32>
    %64 = arith.addf %60, %63 : vector<8x1xf32>
    %65 = vector.extract_strided_slice %51 {offsets = [24, 0], sizes = [8, 8], strides = [1, 1]} : vector<32x8xf32> to vector<8x8xf32>
    %66 = vector.extract_strided_slice %27 {offsets = [0, 3], sizes = [8, 1], strides = [1, 1]} : vector<8x4xf32> to vector<8x1xf32>
    %cst_33 = arith.constant dense<0.000000e+00> : vector<8x1xf32>
    %67 = tpu.matmul %65, %66, %cst_33 {dimension_numbers = #tpu.dot_dimension_numbers<[1], [0], [0], [1], [0, 0, 1, 1], [], []>} : vector<8x8xf32>, vector<8x1xf32>, vector<8x1xf32> -> vector<8x1xf32>
    %68 = arith.addf %64, %67 : vector<8x1xf32>
    %cst_34 = arith.constant dense<0.000000e+00> : vector<8x1xf32>
    %69 = tpu.matmul %2, %68, %cst_34 {dimension_numbers = #tpu.dot_dimension_numbers<[1], [0], [0], [1], [0, 0, 1, 1], [], []>} : vector<8x8xf32>, vector<8x1xf32>, vector<8x1xf32> -> vector<8x1xf32>
    %70 = arith.negf %69 : vector<8x1xf32>
    %71 = math.exp %70 : vector<8x1xf32>
    %cst_35 = arith.constant 1.000000e+00 : f32
    %72 = vector.broadcast %cst_35 : f32 to vector<8x1xf32>
    %73 = arith.addf %72, %71 : vector<8x1xf32>
    %74 = arith.divf %72, %73 : vector<8x1xf32>
    %c0_36 = arith.constant 0 : index
    %c0_37 = arith.constant 0 : index
    %c0_38 = arith.constant 0 : index
    %75 = vector.load %arg1[%c0_36, %c0_37, %c0_38] : memref<1x8x1024xf32, #tpu.memory_space<vmem>>, vector<1x8x1024xf32>
    %76 = vector.shape_cast %75 : vector<1x8x1024xf32> to vector<8x1024xf32>
    %77 = vector.broadcast %74 : vector<8x1xf32> to vector<8x1024xf32>
    %78 = arith.mulf %76, %77 : vector<8x1024xf32>
    %c0_39 = arith.constant 0 : index
    %c0_40 = arith.constant 0 : index
    %c0_41 = arith.constant 0 : index
    %79 = vector.load %arg5[%c0_39, %c0_40, %c0_41] : memref<1x8x1024xf32, #tpu.memory_space<vmem>>, vector<1x8x1024xf32>
    %80 = vector.shape_cast %79 : vector<1x8x1024xf32> to vector<8x1024xf32>
    %81 = vector.shape_cast %78 : vector<8x1024xf32> to vector<1x8x1024xf32>
    tpu.vector_store %arg5[%c0_39, %c0_40, %c0_41], %81 {strides = array<i32>} : memref<1x8x1024xf32, #tpu.memory_space<vmem>>, vector<1x8x1024xf32>,
    return
  }
  func.func @transform_0(%arg0: i32) -> (i32, i32, i32) {
    %c0_i32 = arith.constant 0 : i32
    %c0_i32_0 = arith.constant 0 : i32
    %c0_i32_1 = arith.constant 0 : i32
    return %arg0, %c0_i32, %c0_i32_0 : i32, i32, i32
  }
  func.func @transform_1(%arg0: i32) -> (i32, i32) {
    %c0_i32 = arith.constant 0 : i32
    %c0_i32_0 = arith.constant 0 : i32
    %c0_i32_1 = arith.constant 0 : i32
    return %c0_i32, %c0_i32_0 : i32, i32
  }
  func.func @transform_2(%arg0: i32) -> (i32, i32) {
    %c0_i32 = arith.constant 0 : i32
    %c0_i32_0 = arith.constant 0 : i32
    %c0_i32_1 = arith.constant 0 : i32
    return %c0_i32, %c0_i32_0 : i32, i32
  }
  func.func @transform_3(%arg0: i32) -> (i32, i32) {
    %c0_i32 = arith.constant 0 : i32
    %c0_i32_0 = arith.constant 0 : i32
    %c0_i32_1 = arith.constant 0 : i32
    return %c0_i32, %c0_i32_0 : i32, i32
  }
  func.func @transform_4(%arg0: i32) -> (i32, i32, i32) {
    %c0_i32 = arith.constant 0 : i32
    %c0_i32_0 = arith.constant 0 : i32
    %c0_i32_1 = arith.constant 0 : i32
    return %arg0, %c0_i32, %c0_i32_0 : i32, i32, i32
  }
}

</mosaic_0001>

<bundles_post_ra>
// kernel: tpu_custom_call.1
= control target key start
LH: loop header
LB: loop body
LE: loop exit
PB: predicated region body
PF: predicated region fallthrough
CT: control target
= control target key end

     0   :  { %9 = vsyncpa [#allocation3], 0  ;;  %s1889_s0 = inlined_call_operand.hbm [shape: f32[2,8,1024], index: 0, kind: input, shape index: {}]   ;;  %s1890_s1 = inlined_call_operand.vmem [shape: bf16[16,8], index: 1, kind: input, shape index: {}]   ;;  %s1891_s2 = inlined_call_operand.vmem [shape: f32[8,8], index: 2, kind: input, shape index: {}]   ;;  %s1892_s3 = inlined_call_operand.vmem [shape: f32[8,8], index: 3, kind: input, shape index: {}]   ;;  %s1893_s4 = inlined_call_operand.hbm [shape: f32[2,8,1024], index: 4, kind: output, shape index: {}]  }
   0x1   :  { %11 = vsyncpa [#allocation3 + $0x1], 0 }
   0x2   :  { %12 = vsyncpa [#allocation4], 0 }
   0x3   :  { %14 = vsyncpa [#allocation4 + $0x1], 0  ;;  %s1631_s15 = smov 0   ;;  %s1633_s16 = smov 0  }
   0x4   :  { %s1635_s17 = smov 0   ;;  %s1637_s18 = smov 0  }
   0x5 LB: > { %s1652_s19 = sadd.s32 4294967295, %s1596_s18   ;;  %s1355_s20 = sadd.s32 4294967294, %s1596_s18   ;;  %s1596_s18 = sphi %s1637_s18, %s1910_s18   ;;  %s1592_s17 = sphi %s1635_s17, %s1909_s17   ;;  %s1588_s16 = sphi %s1633_s16, %s1908_s16   ;;  %s1584_s15 = sphi %s1631_s15, %s1907_s15  }
   0x6   : > { %s1656_s21 = sadd.s32 1, %s1596_s18   ;;  %s27_s22 = sadd.s32 1, %s1592_s17 }
   0x7   : > { %s24_s23 = ssub.s32 %s1596_s18, %s1656_s21  ;;  %p34_p0 = scmp.ne.s32.totalorder %s1592_s17, %s1588_s16 }
   0x8   : > { %p25_p1 = scmp.eq.s32.totalorder %s24_s23, 0  ;;  %p35_p2 = scmp.eq.s32.totalorder %s1596_s18, 0 }
   0x9   : > { %p40_p3 = scmp.ne.s32.totalorder %s1588_s16, %s1584_s15  ;;  %p41_p4 = scmp.eq.s32.totalorder %s1652_s19, 0 }
   0xa   : > { %s1668_s24 = scalar_select %p25_p1, %s1592_s17, %s27_s22  }
   0xb   : > { %p1670_p5 = por %p35_p2, %p34_p0  ;;  %p1674_p6 = por %p41_p4, %p40_p3 }
   0xc   : > { %p127_p7 = scmp.eq.s32.totalorder %s1652_s19, 1  ;;  %p133_p8 = scmp.eq.s32.totalorder %s1355_s20, 1 }
   0xd   : > { %s1897_s26 = scalar_select %p1674_p6, 1, 0 }
   0xe   : > { %p1441_p10 = scmp.lt.s32.totalorder %s1596_s18, 2  ;;  %p1681_p11 = por %p127_p7, %p34_p0 }
   0xf   : > { %p1685_p12 = por %p133_p8, %p40_p3  ;;  %s162_s29 = sand.u32 1, %s1592_s17  }
  0x10   : > { %s1898_s27 = scalar_select %p1681_p11, 1, 0 }
  0x11   : > { %s1899_s28 = scalar_select %p1685_p12, 1, 0 }
  0x12   : > { %s1385_s30 = sshll.u32 %s1596_s18, 10  ;;  %s1358_s5 = sshll.u32 %s162_s29, 6 }
  0x13   : > { %s1694_s8 = scalar_lea.hbm %s1889_s0, %s1385_s30  ;;  %s166_s9 = scalar_lea.vmem [#allocation2], %s1358_s5 }
  0x14   : > { %s174_s10 = sshll.u32 %s166_s9, 4  ;;  %p1698_p13 = pnand %p1441_p10, %p1670_p5  ;;  %s1702_s10 = int_to_ptr.vmem [resolvable:$true] %s174_s10 }
  0x15   : > { %s163_s12 = scalar_lea.sflag [#allocation3], %s162_s29  ;;  %s1504_s13 = scalar_lea.hbm %s1694_s8, 1024 }
  0x16   : > { %p1505_p2 = scmp.ne.s32.totalorder %s1694_s8, %s1504_s13  ;;  %p1506_p3 = pneg %p1698_p13 }
  0x17   : > { %s1509_s22 = scalar_lea.hbm %s1889_s0, 2048  ;;  %p1510_p5 = scmp.lt.s32.totalorder %s1694_s8, %s1889_s0 }
  0x18   : > { %p1507_p4 = pnand %p1506_p3, %p1505_p2  ;;  %p1511_p8 = scmp.lt.s32.totalorder %s1509_s22, %s1504_s13 }
  0x1a   : > { %p1508_p7 = pneg %p1507_p4  ;;  %p1512_p10 = por %p1511_p8, %p1510_p5 }
  0x1c   : > { %p1513_p9 = pnand %p1512_p10, %p1508_p7 }
  0x1e   : > { %1516 = shalt.err (!%p1513_p9)
}
  0x1f   : > { %s1517_s29 = scalar_lea.vmem %s1702_s10, 1024  ;;  %s1598_s30 = smov [#allocation2]  }
  0x20   : > { %p1518_p0 = scmp.ne.s32.totalorder %s1702_s10, %s1517_s29  ;;  %s1522_s5 = sshll.u32 %s1598_s30, 4  ;;  %s1523_s5 = int_to_ptr.vmem [resolvable:$false] %s1522_s5 }
  0x21   : > { %s1524_s6 = scalar_lea.vmem %s1523_s5, 2048  ;;  %p1525_p4 = scmp.lt.s32.totalorder %s1702_s10, %s1523_s5 }
  0x22   : > { %p1520_p1 = pnand %p1518_p0, %p1506_p3  ;;  %p1526_p12 = scmp.lt.s32.totalorder %s1524_s6, %s1517_s29 }
  0x24   : > { %p1521_p2 = pneg %p1520_p1  ;;  %p1527_p11 = por %p1526_p12, %p1525_p4 }
  0x26   : > { %p1528_p6 = pnand %p1527_p11, %p1521_p2 }
  0x28   : > { %1531 = shalt.err (!%p1528_p6)
}
  0x29   : > { %1436 = dma.hbm_to_vmem [thread:$0]  (!%p1698_p13), %s1694_s8, 1024, %s1702_s10, %s163_s12  }
  0x2a   : > { %p1901_p9 = scmp.lt.s32.totalorder %s1596_s18, 3  ;;  %p1902_p7 = scmp.ge.s32.totalorder %s1596_s18, 1 }
  0x2c   : > { %p180_p0 = pnand %p1902_p7, %p1901_p9 }
  0x2d   : > { %s1729_s7 = sand.u32 (!%p180_p0), 1, %s1588_s16   ;;  %p1903_p6 = scmp.ne.s32.totalorder (!%p180_p0), %s1897_s26, 0 }
  0x2e   : > { %183 = sbr.rel (%p180_p0) target bundleno = 1384 (0x568), region = 36  ;;  %s1362_s9 = sshll.u32 (!%p180_p0), %s1729_s7, 6 }
  0x2f   : > { %s186_s13 = scalar_lea.sflag (!%p180_p0), [#allocation3], %s1729_s7  ;;  %s189_s11 = scalar_lea.vmem (!%p180_p0), [#allocation2], %s1362_s9 }
  0x33   : > { %1575 = dma.done.wait (%p1903_p6), %s186_s13, 1024  }
  0x34   : > { %1577 = vsyncadd (%p1903_p6), %s186_s13, 4294966272  ;;  %v1599_v0 = vmov 0   ;;  %v1739_v1 = vld [vmem:[%s189_s11 + $0x8] sm:$0xff]  ;;  %vm244_vm0 = vcmask 1043456   ;;  %v1741_v2 = vld [vmem:[%s189_s11 + $0x18] sm:$0xff]  ;;  %vm240_vm1 = vcmask 64512  }
  0x35   : > { %301 = vmatprep.mubr.bf16.mxu0 %v1599_v0  ;;  %344 = vmatprep.mubr.bf16.mxu1 %v1599_v0  ;;  %v1743_v3 = vld [vmem:[%s189_s11] sm:$0xff]  ;;  %v228_v4 = vpack.c.bf16 %v1739_v1, %v1739_v1  ;;  %v230_v5 = vpack.c.bf16 %v1741_v2, %v1741_v2  ;;  %v1751_v7 = vld [vmem:[%s189_s11 + $0x10] sm:$0xff]  ;;  %v1757_v10 = vld [vmem:[%s189_s11 + $0x28] sm:$0xff]  ;;  %v1600_v26 = vmov 0.0   ;;  %vm1601_vm2 = vmmov 0   ;;  %s1602_s14 = smov 126  }
  0x36   : > { %1481 = vset.pattern.permute.xlu1 %v1599_v0  ;;  %1482 = vset.pattern.permute.xlu0 %v1599_v0  ;;  %v227_v6 = vpack.c.bf16 %v1743_v3, %v1743_v3  ;;  %v443_v8 = vadd.f32 %v1739_v1, %v1743_v3  ;;  %v229_v9 = vpack.c.bf16 %v1751_v7, %v1751_v7  ;;  %v1759_v11 = vld [vmem:[%s189_s11 + $0x38] sm:$0xff]  ;;  %v1483_v13 = vld [vmem:[%s1890_s1] sm:$0xff]   ;;  %v1773_v17 = vld [vmem:[%s189_s11 + $0x30] sm:$0xff]  ;;  %vm459_vm3 = vcmask 7168   ;;  %s1603_s20 = smov 127   ;;  %s1604_s22 = smov 125  }
  0x37   : > { %1365 = vmatprep.subr.msk.bf16.mxu0 %vm244_vm0, %v228_v4  ;;  %1367 = vmatprep.subr.msk.bf16.mxu1 %vm244_vm0, %v230_v5  ;;  %v232_v14 = vpack.c.bf16 %v1757_v10, %v1757_v10  ;;  %v234_v15 = vpack.c.bf16 %v1759_v11, %v1759_v11  ;;  %v1771_v16 = vld [vmem:[%s189_s11 + $0x20] sm:$0xff]  ;;  %v233_v20 = vpack.c.bf16 %v1773_v17, %v1773_v17  ;;  %vm461_vm4 = vcmask 15360   ;;  %s1386_s29 = sshll.u32 %s1652_s19, 10  ;;  %s213_s30 = scalar_lea.vmem [#allocation5], %s1362_s9 }
  0x38   : > { %v246_v12 = vsel %vm244_vm0, %v227_v6, 0  ;;  %v252_v18 = vsel %vm244_vm0, %v229_v9, 0  ;;  %v231_v19 = vpack.c.bf16 %v1771_v16, %v1771_v16  ;;  %444 = vadd.xlane.f32.xlu0 %v443_v8  ;;  %v453_v21 = vadd.f32 %v1757_v10, %v1771_v16  ;;  %v217_v33 = vld [vmem:[%s1891_s2] sm:$0xff]  ;;  %s1285_s5 = sshll.u32 %s213_s30, 4  ;;  %s1846_s9 = scalar_lea.hbm %s1893_s4, %s1386_s29  ;;  %s1848_s5 = int_to_ptr.vmem [resolvable:$true] %s1285_s5 }
  0x39   : > { %284 = vmatpush1.bf16.msra.mxu0 %v246_v12  ;;  %327 = vmatpush1.bf16.msra.mxu1 %v252_v18  ;;  %v264_v23 = vsel %vm244_vm0, %v233_v20, 0  ;;  %v448_v24 = vadd.f32 %v1741_v2, %v1751_v7  ;;  %v456_v25 = vadd.f32 %v1759_v11, %v1773_v17  ;;  %vm463_vm5 = vcmask 23552   ;;  %s1271_s13 = scalar_lea.sflag [#allocation4], %s1729_s7  ;;  %s1532_s11 = scalar_lea.vmem %s1848_s5, 1024 }
  0x3a   : > { %1369 = vmatprep.subr.msk.bf16.mxu0 %vm244_vm0, %v232_v14  ;;  %1371 = vmatprep.subr.msk.bf16.mxu1 %vm244_vm0, %v234_v15  ;;  %v258_v22 = vsel %vm244_vm0, %v231_v19, 0  ;;  %p1533_p11 = scmp.ne.s32.totalorder %s1848_s5, %s1532_s11  ;;  %p1904_p12 = scmp.ne.s32.totalorder %s1898_s27, 0 }
  0x3b   : > { %454 = vadd.xlane.f32.xlu1 %v453_v21  ;;  %s1605_s26 = smov [#allocation5]  }
  0x3c   : > { %1366 = vmatmul.mubr.msk.bf16.vlgmr.msra.gmra.mxu0 %vm240_vm1, %v1483_v13  ;;  %1368 = vmatmul.mubr.msk.bf16.vlgmr.msra.gmra.mxu1 %vm240_vm1, %v1483_v13  ;;  %p1534_p13 = pnand %p1533_p11, %p1904_p12  ;;  %s1536_s8 = sshll.u32 %s1605_s26, 4  ;;  %s1537_s8 = int_to_ptr.vmem [resolvable:$false] %s1536_s8 }
  0x3d   : > { %370 = vmatpush1.bf16.msra.mxu0 %v258_v22  ;;  %413 = vmatpush1.bf16.msra.mxu1 %v264_v23  ;;  %s1538_s10 = scalar_lea.vmem %s1537_s8, 2048  ;;  %p1539_p3 = scmp.lt.s32.totalorder %s1848_s5, %s1537_s8 }
  0x3e   : > { %387 = vmatprep.mubr.bf16.mxu0 %v1599_v0  ;;  %430 = vmatprep.mubr.bf16.mxu1 %v1599_v0  ;;  %p1535_p1 = pneg %p1534_p13  ;;  %p1540_p5 = scmp.lt.s32.totalorder %s1538_s10, %s1532_s11 }
  0x3f   : > { %449 = vadd.xlane.f32.xlu0 %v448_v24  ;;  %457 = vadd.xlane.f32.xlu1 %v456_v25 }
  0x40   : > { %1399 = vmatprep.subr.mxu0 %v1600_v26  ;;  %p1541_p8 = por %p1540_p5, %p1539_p3 }
  0x42   : > { %p1542_p10 = pnand %p1541_p8, %p1535_p1 }
  0x44   : > { %1370 = vmatmul.mubr.msk.bf16.vlgmr.msra.gmra.mxu0 %vm240_vm1, %v1483_v13  ;;  %1372 = vmatmul.mubr.msk.bf16.vlgmr.msra.gmra.mxu1 %vm240_vm1, %v1483_v13 }
  0x45   : > { %1401 = vmatprep.mubr.msk.f32.mxu0 %vm1601_vm2, %v1600_v26 }
  0xc1   : > { %v445_v27 = vpop.xlane.xlu0 %444 }
  0xc4   : > { %v455_v28 = vpop.xlane.xlu1 %454 }
  0xc8   : > { %v450_v29 = vpop.xlane.xlu0 %449  ;;  %v458_v31 = vpop.xlane.xlu1 %457 }
  0xc9   : > { %v460_v30 = vsel %vm459_vm3, %v445_v27, %v450_v29 }
  0xca   : > { %v462_v32 = vsel %vm461_vm4, %v460_v30, %v455_v28 }
  0xcb   : > { %v464_v34 = vsel %vm463_vm5, %v462_v32, %v458_v31 }
  0xcc   : > { %1400 = vmatpush3.msra.mxu0 %v464_v34 }
  0xcd   : > { %1402 = vmatmul.mubr.msk.f32.vlgmr.msra.gmra.mxu0 %vm240_vm1, %v217_v33 }
  0xfc   : > { %v303_v35 = vpop.f32.mrf.mxu0  ;;  %v346_v36 = vpop.f32.mrf.mxu1 }
  0xfe   : > { %v305_v37 = vpop.f32.mrf.mxu0  ;;  %v348_v38 = vpop.f32.mrf.mxu1 }
  0xff   : > { %602 = vmatprep.mubr.f32.mxu1 %v305_v37  ;;  %672 = vmatprep.mubr.f32.mxu0 %v348_v38 }
 0x100   : > { %v307_v39 = vpop.f32.mrf.mxu0  ;;  %v350_v40 = vpop.f32.mrf.mxu1 }
 0x102   : > { %v309_v41 = vpop.f32.mrf.mxu0  ;;  %v352_v42 = vpop.f32.mrf.mxu1 }
 0x103   : > { %568 = vmatprep.subr.mxu1 %v309_v41  ;;  %638 = vmatprep.subr.mxu0 %v352_v42 }
 0x104   : > { %v389_v43 = vpop.f32.mrf.mxu0  ;;  %569 = vmatpush1.xpose.msra.mxu1 %v307_v39  ;;  %v432_v44 = vpop.f32.mrf.mxu1  ;;  %639 = vmatpush1.xpose.msra.mxu0 %v350_v40 }
 0x106   : > { %v391_v45 = vpop.f32.mrf.mxu0  ;;  %v434_v46 = vpop.f32.mrf.mxu1 }
 0x107   : > { %603 = vmatmul.mubr.f32.vlgmr.msra.gmra.mxu1 %v303_v35  ;;  %673 = vmatmul.mubr.f32.vlgmr.msra.gmra.mxu0 %v346_v36 }
 0x108   : > { %v393_v47 = vpop.f32.mrf.mxu0  ;;  %742 = vmatprep.mubr.f32.mxu1 %v391_v45  ;;  %v436_v48 = vpop.f32.mrf.mxu1  ;;  %812 = vmatprep.mubr.f32.mxu0 %v434_v46 }
 0x10a   : > { %v395_v49 = vpop.f32.mrf.mxu0  ;;  %v438_v50 = vpop.f32.mrf.mxu1 }
 0x10b   : > { %708 = vmatprep.subr.mxu1 %v395_v49  ;;  %778 = vmatprep.subr.mxu0 %v438_v50 }
 0x10c   : > { %709 = vmatpush1.xpose.msra.mxu1 %v393_v47  ;;  %779 = vmatpush1.xpose.msra.mxu0 %v436_v48 }
 0x10d   : > { %1404 = vmatprep.subr.mxu1 %v1600_v26  ;;  %1409 = vmatprep.subr.mxu0 %v1600_v26 }
 0x10f   : > { %743 = vmatmul.mubr.f32.vlgmr.msra.gmra.mxu1 %v389_v43  ;;  %813 = vmatmul.mubr.f32.vlgmr.msra.gmra.mxu0 %v432_v44 }
 0x110   : > { %1406 = vmatprep.mubr.msk.f32.mxu1 %vm1601_vm2, %v1600_v26  ;;  %1411 = vmatprep.mubr.msk.f32.mxu0 %vm1601_vm2, %v1600_v26 }
 0x18d   : > { %v534_v51 = vpop.f32.mrf.mxu0 }
 0x18e   : > { %1410 = vmatpush3.msra.mxu0 %v534_v51 }
 0x18f   : > { %v1403_v52 = vpop.f32.mrf.mxu0  ;;  %1419 = vmatprep.subr.mxu0 %v1600_v26 }
 0x1c7   : > { %v604_v53 = vpop.f32.mrf.mxu1  ;;  %v674_v54 = vpop.f32.mrf.mxu0 }
 0x1c8   : > { %v818_v55 = vsel %vm240_vm1, %v604_v53, -inf  ;;  %v821_v57 = vsel %vm240_vm1, %v674_v54, -inf }
 0x1c9   : > { %819 = vmax.xlane.f32.xlu1 %v818_v55  ;;  %v606_v56 = vpop.f32.mrf.mxu1  ;;  %822 = vmax.xlane.f32.xlu0 %v821_v57  ;;  %v676_v58 = vpop.f32.mrf.mxu0 }
 0x1cf   : > { %v744_v59 = vpop.f32.mrf.mxu1  ;;  %v814_v60 = vpop.f32.mrf.mxu0 }
 0x1d0   : > { %v824_v61 = vsel %vm240_vm1, %v744_v59, -inf  ;;  %v827_v62 = vsel %vm240_vm1, %v814_v60, -inf }
 0x1d1   : > { %825 = vmax.xlane.f32.xlu0 %v824_v61  ;;  %v746_v63 = vpop.f32.mrf.mxu1  ;;  %828 = vmax.xlane.f32.xlu1 %v827_v62  ;;  %v816_v0 = vpop.f32.mrf.mxu0 }
 0x252   : > { %v820_v4 = vpop.xlane.xlu1 %819  ;;  %v823_v6 = vpop.xlane.xlu0 %822 }
 0x253   : > { %v830_v5 = vsub.f32 %v604_v53, %v820_v4  ;;  %v831_v8 = vsub.f32 %v674_v54, %v823_v6  ;;  %v218_v54 = vld [vmem:[%s1892_s3] sm:$0xff] }
 0x255   : > { %v834_v9 = vmul.f32 1.442695, %v830_v5  ;;  %v836_v12 = vmul.f32 1.442695, %v831_v8 }
 0x257   : > { %1484 = vpow2.f32 %v834_v9 }
 0x258   : > { %1486 = vpow2.f32 %v836_v12 }
 0x25a   : > { %v826_v13 = vpop.xlane.xlu0 %825  ;;  %v829_v24 = vpop.xlane.xlu1 %828 }
 0x25b   : > { %v832_v14 = vsub.f32 %v744_v59, %v826_v13  ;;  %v833_v25 = vsub.f32 %v814_v60, %v829_v24 }
 0x25d   : > { %v838_v15 = vmul.f32 1.442695, %v832_v14  ;;  %v840_v27 = vmul.f32 1.442695, %v833_v25 }
 0x25f   : > { %1488 = vpow2.f32 %v838_v15 }
 0x260   : > { %1490 = vpow2.f32 %v840_v27 }
 0x264   : > { %v1485_v18 = vpop.eup %1484 }
 0x265   : > { %v1487_v19 = vpop.eup %1486  ;;  %v842_v20 = vsel %vm240_vm1, %v1485_v18, 0.0 }
 0x266   : > { %v845_v21 = vsel %vm240_vm1, %v1487_v19, 0.0  ;;  %843 = vadd.xlane.f32.xlu1 %v842_v20 }
 0x267   : > { %846 = vadd.xlane.f32.xlu0 %v845_v21 }
 0x26c   : > { %v1489_v22 = vpop.eup %1488 }
 0x26d   : > { %v848_v23 = vsel %vm240_vm1, %v1489_v22, 0.0  ;;  %v1491_v28 = vpop.eup %1490 }
 0x26e   : > { %849 = vadd.xlane.f32.xlu0 %v848_v23  ;;  %v851_v29 = vsel %vm240_vm1, %v1491_v28, 0.0 }
 0x277   : > { %1016 = vrot.lane.b32.xlu1 %v534_v51, %s1602_s14 }
 0x284   : > { %867 = vrot.lane.b32.xlu0 %v534_v51, %s1603_s20 }
 0x29b   : > { %852 = vadd.xlane.f32.xlu1 %v851_v29 }
 0x2ac   : > { %1093 = vrot.lane.b32.xlu1 %v534_v51, %s1604_s22 }
 0x2ef   : > { %v844_v30 = vpop.xlane.xlu1 %843 }
 0x2f0   : > { %v847_v31 = vpop.xlane.xlu0 %846  ;;  %1492 = vrcp.f32 %v844_v30 }
 0x2f1   : > { %1494 = vrcp.f32 %v847_v31 }
 0x2f3   : > { %v1017_v38 = vpop.permute.xlu1 %1016 }
 0x2f7   : > { %v850_v32 = vpop.xlane.xlu0 %849 }
 0x2f8   : > { %1496 = vrcp.f32 %v850_v32 }
 0x2fb   : > { %v868_v33 = vpop.permute.xlu0 %867 }
 0x2fc   : > { %1405 = vmatpush3.msra.mxu1 %v868_v33 }
 0x2fd   : > { %v1493_v34 = vpop.eup %1492  ;;  %1414 = vmatprep.subr.mxu1 %v1600_v26 }
 0x2fe   : > { %v1495_v35 = vpop.eup %1494  ;;  %v862_v36 = vmul.f32 %v1493_v34, %v1485_v18 }
 0x2ff   : > { %v863_v37 = vmul.f32 %v1495_v35, %v1487_v19 }
 0x300   : > { %1412 = vmatmul.mubr.msk.f32.vlgmr.msra.gmra.mxu0 %vm240_vm1, %v862_v36 }
 0x301   : > { %1407 = vmatmul.mubr.msk.f32.vlgmr.msra.gmra.mxu1 %vm240_vm1, %v863_v37  ;;  %1421 = vmatprep.mubr.msk.f32.mxu0 %vm1601_vm2, %v1600_v26 }
 0x302   : > { %1415 = vmatpush3.msra.mxu1 %v1017_v38  ;;  %1416 = vmatprep.mubr.msk.f32.mxu1 %vm1601_vm2, %v1600_v26 }
 0x303   : > { %1424 = vmatprep.subr.mxu1 %v1600_v26 }
 0x305   : > { %v1497_v39 = vpop.eup %1496 }
 0x306   : > { %v864_v40 = vmul.f32 %v1497_v39, %v1489_v22 }
 0x308   : > { %1417 = vmatmul.mubr.msk.f32.vlgmr.msra.gmra.mxu1 %vm240_vm1, %v864_v40 }
 0x309   : > { %1426 = vmatprep.mubr.msk.f32.mxu1 %vm1601_vm2, %v1600_v26 }
 0x324   : > { %v853_v41 = vpop.xlane.xlu1 %852 }
 0x325   : > { %1498 = vrcp.f32 %v853_v41 }
 0x328   : > { %v1094_v42 = vpop.permute.xlu1 %1093 }
 0x329   : > { %1420 = vmatpush3.msra.mxu0 %v1094_v42 }
 0x332   : > { %v1499_v43 = vpop.eup %1498 }
 0x333   : > { %v865_v44 = vmul.f32 %v1499_v43, %v1491_v28 }
 0x335   : > { %1422 = vmatmul.mubr.msk.f32.vlgmr.msra.gmra.mxu0 %vm240_vm1, %v865_v44 }
 0x3c0   : > { %v1012_v45 = vpop.f32.mrf.mxu0 }
 0x3c1   : > { %v939_v46 = vpop.f32.mrf.mxu1 }
 0x3c2   : > { %v1413_v47 = vpop.f32.mrf.mxu0  ;;  %v1013_v51 = vadd.f32 %v1012_v45, %v939_v46 }
 0x3c3   : > { %v1408_v48 = vpop.f32.mrf.mxu1 }
 0x3c8   : > { %v1088_v49 = vpop.f32.mrf.mxu1 }
 0x3c9   : > { %v1092_v52 = vadd.f32 %v1088_v49, %v1013_v51 }
 0x3ca   : > { %v1418_v50 = vpop.f32.mrf.mxu1 }
 0x3f5   : > { %v1165_v53 = vpop.f32.mrf.mxu0 }
 0x3f6   : > { %v1169_v26 = vadd.f32 %v1165_v53, %v1092_v52 }
 0x3f7   : > { %v1423_v55 = vpop.f32.mrf.mxu0 }
 0x3f8   : > { %1425 = vmatpush3.msra.mxu1 %v1169_v26 }
 0x3f9   : > { %1427 = vmatmul.mubr.msk.f32.vlgmr.msra.gmra.mxu1 %vm240_vm1, %v218_v54 }
 0x4b9   : > { %v1239_v56 = vpop.f32.mrf.mxu1 }
 0x4ba   : > { %v1379_v57 = vmul.f32 -1.442695, %v1239_v56 }
 0x4bb   : > { %v1428_v58 = vpop.f32.mrf.mxu1 }
 0x4bc   : > { %1500 = vpow2.f32 %v1379_v57 }
 0x4c9   : > { %v1501_v59 = vpop.eup %1500 }
 0x4ca   : > { %v1246_v60 = vadd.f32 1.0, %v1501_v59 }
 0x4cc   : > { %1502 = vrcp.f32 %v1246_v60 }
 0x4d9   : > { %v1503_v61 = vpop.eup %1502 }
 0x4da   : > { %1251 = vperm.xlu1 %1481, %v1503_v61  }
 0x555   : > { %v1252_v62 = vpop.permute.xlu1 %1251 }
 0x556   : > { %v1254_v63 = vmul.f32 %v1252_v62, %v1743_v3  ;;  %v1255_v0 = vmul.f32 %v1252_v62, %v1739_v1  ;;  %v1256_v4 = vmul.f32 %v1252_v62, %v1751_v7  ;;  %v1257_v5 = vmul.f32 %v1252_v62, %v1741_v2 }
 0x557   : > { %v1258_v6 = vmul.f32 %v1252_v62, %v1771_v16  ;;  %v1259_v8 = vmul.f32 %v1252_v62, %v1757_v10  ;;  %v1260_v9 = vmul.f32 %v1252_v62, %v1773_v17  ;;  %v1261_v12 = vmul.f32 %v1252_v62, %v1759_v11 }
 0x558   : > { %1262 = vst [vmem:[%s213_s30] sm:$0xff] %v1254_v63  ;;  %1263 = vst [vmem:[%s213_s30 + $0x8] sm:$0xff] %v1255_v0 }
 0x559   : > { %1264 = vst [vmem:[%s213_s30 + $0x10] sm:$0xff] %v1256_v4  ;;  %1265 = vst [vmem:[%s213_s30 + $0x18] sm:$0xff] %v1257_v5 }
 0x55a   : > { %1266 = vst [vmem:[%s213_s30 + $0x20] sm:$0xff] %v1258_v6  ;;  %1267 = vst [vmem:[%s213_s30 + $0x28] sm:$0xff] %v1259_v8 }
 0x55b   : > { %1268 = vst [vmem:[%s213_s30 + $0x30] sm:$0xff] %v1260_v9  ;;  %1269 = vst [vmem:[%s213_s30 + $0x38] sm:$0xff] %v1261_v12 }
 0x55c   : > { %1545 = shalt.err (!%p1542_p10)
}
 0x55d   : > { %s1546_s12 = scalar_lea.hbm %s1846_s9, 1024  ;;  %s1550_s20 = scalar_lea.hbm %s1893_s4, 2048 }
 0x55e   : > { %p1547_p2 = scmp.ne.s32.totalorder %s1846_s9, %s1546_s12  ;;  %p1551_p7 = scmp.lt.s32.totalorder %s1846_s9, %s1893_s4 }
 0x55f   : > { %p1552_p0 = scmp.lt.s32.totalorder %s1550_s20, %s1546_s12 }
 0x560   : > { %p1548_p4 = pnand %p1547_p2, %p1904_p12 }
 0x561   : > { %p1553_p6 = por %p1552_p0, %p1551_p7 }
 0x562   : > { %p1549_p9 = pneg %p1548_p4 }
 0x564   : > { %p1554_p11 = pnand %p1553_p6, %p1549_p9 }
 0x566   : > { %1557 = shalt.err (!%p1554_p11)
}
 0x567   : > { %1431 = dma.vmem_to_hbm [thread:$0]  (%p1904_p12), %s1848_s5, 1024, %s1846_s9, %s1271_s13  }
 0x568 PF: > { %s1297_s25 = sand.u32 1, %s1584_s15   ;;  %p1905_p13 = scmp.ne.s32.totalorder %s1899_s28, 0 }
 0x569   : > { %p1906_p1 = scmp.ge.s32.totalorder %s1596_s18, 2  ;;  %s1298_s29 = scalar_lea.sflag [#allocation4], %s1297_s25 }
 0x56b   : > { %p1438_p3 = pnand %p1906_p1, %p1905_p13 }
 0x56d   : > { %p1439_p5 = pneg %p1438_p3 }
 0x56f   : > { %1579 = dma.done.wait (%p1439_p5), %s1298_s29, 1024  }
 0x570   : > { %1581 = vsyncadd (%p1439_p5), %s1298_s29, 4294966272  ;;  %p17_p8 = scmp.ge.s32.totalorder %s1656_s21, 4   ;;  %s1907_s15 = smov %s1588_s16 }
 0x571   : > { %s1908_s16 = smov %s1592_s17  ;;  %s1909_s17 = smov %s1668_s24 }
 0x572   : > { %s1910_s18 = smov %s1656_s21  ;;  %19 = sbr.rel (!%p17_p8) target bundleno = 5 (0x5), region = 81 }
 0x577   :  { %1303 = vsyncpa [#allocation3], 1 }
 0x578   :  { %1305 = vsyncpa [#allocation3 + $0x1], 1 }
 0x579   :  { %1306 = vsyncpa [#allocation4], 1 }
 0x57a   :  { %1308 = vsyncpa [#allocation4 + $0x1], 1 }

</bundles_post_ra>
